<compile_context>
chip_gen: v5e
topology: v5e:2x2
jax: 0.10.0
libtpu: 0.0.40
codegen_flags: <defaults>
</compile_context>

<pallas_src>
import functools
import math

import jax
import jax.numpy as jnp
from jax.experimental import pallas as pl
from jax.experimental.pallas import tpu as pltpu


def _round_up(n, m):
    return ((n + m - 1) // m) * m


def _fnn_kernel(x_ref, *args):
    """Fused forward over all layers.

    args = (w0_ref, b0_ref, w1_ref, b1_ref, ..., o_ref)
      x_ref : (tm, d0_pad)              activation tile
      w_l   : (d_l_pad, d_{l+1}_pad)    pre-transposed, zero-padded weight
      b_l   : (1, d_{l+1}_pad)          zero-padded bias
      o_ref : (tm, d_L_pad)
    """
    o_ref = args[-1]
    param_refs = args[:-1]
    n_layers = len(param_refs) // 2

    h = x_ref[...]
    for l in range(n_layers):                      # static unroll over layers
        w = param_refs[2 * l][...]
        b = param_refs[2 * l + 1][...]
        h = jnp.dot(h, w, preferred_element_type=jnp.float32) + b
    o_ref[...] = h.astype(o_ref.dtype)


def _fnn_forward(x, *flat_padded_params, out_dim):
    """x: (B, d0). flat_padded_params = w0,b0,w1,b1,... (padded, transposed)."""
    B, d_in = x.shape
    n_layers = len(flat_padded_params) // 2
    d0_pad = flat_padded_params[0].shape[0]
    dL_pad = flat_padded_params[-2].shape[1]

    # Batch tiling: multiples of 8 sublanes, up to 256 rows per tile.
    tm = min(_round_up(B, 8), 256)
    B_pad = _round_up(B, tm)

    # Zero-pad batch + feature dims (zeros are inert through every layer since
    # padded weight rows / bias entries are zero).
    x_pad = jnp.zeros((B_pad, d0_pad), x.dtype).at[:B, :d_in].set(x)

    in_specs = [pl.BlockSpec((tm, d0_pad), lambda i: (i, 0))]
    for l in range(n_layers):
        w = flat_padded_params[2 * l]
        b = flat_padded_params[2 * l + 1]
        in_specs.append(pl.BlockSpec(w.shape, lambda i: (0, 0)))   # resident
        in_specs.append(pl.BlockSpec(b.shape, lambda i: (0, 0)))   # resident

    out = pl.pallas_call(
        _fnn_kernel,
        out_shape=jax.ShapeDtypeStruct((B_pad, dL_pad), x.dtype),
        grid_spec=pltpu.PrefetchScalarGridSpec(
            num_scalar_prefetch=0,
            grid=(B_pad // tm,),
            in_specs=in_specs,
            out_specs=pl.BlockSpec((tm, dL_pad), lambda i: (i, 0)),
        ),
        compiler_params=pltpu.CompilerParams(
            dimension_semantics=("parallel",)),
    )(x_pad, *flat_padded_params)

    return out[:B, :out_dim]


class FNN:
    """Fully-connected neural network (stack of Linear layers, no activation)."""

    def __init__(self, layer_sizes, key):
        self.layer_sizes = list(layer_sizes)
        self.params = []              # PyTorch layout: W (out, in), b (out,)
        flat_padded = []
        for i in range(1, len(layer_sizes)):
            fan_in, fan_out = layer_sizes[i - 1], layer_sizes[i]
            key, kw, kb = jax.random.split(key, 3)
            bound = 1.0 / math.sqrt(fan_in)
            # PyTorch nn.Linear default init: U(-1/sqrt(fan_in), 1/sqrt(fan_in))
            w = jax.random.uniform(kw, (fan_out, fan_in), jnp.float32, -bound, bound)
            b = jax.random.uniform(kb, (fan_out,), jnp.float32, -bound, bound)
            self.params.append((w, b))

            # Pre-transpose + lane-pad once (NOT per forward call).
            in_pad, out_pad = _round_up(fan_in, 128), _round_up(fan_out, 128)
            w_t = jnp.zeros((in_pad, out_pad), jnp.float32).at[:fan_in, :fan_out].set(w.T)
            b_p = jnp.zeros((1, out_pad), jnp.float32).at[:, :fan_out].set(b)
            flat_padded.extend([w_t, b_p])

        self._flat_padded = tuple(flat_padded)
        # One jit over the whole forward (a single fused pallas_call inside).
        self._fwd = jax.jit(
            functools.partial(_fnn_forward, out_dim=layer_sizes[-1]))

    def __call__(self, x):
        return self._fwd(x, *self._flat_padded)


if __name__ == "__main__":
    key = jax.random.PRNGKey(0)
    layer_sizes = [16, 32, 32, 8]

    key, kmodel = jax.random.split(key)
    model = FNN(layer_sizes, kmodel)

    def ref_forward(xs):
        y = xs
        for w, b in model.params:
            y = y @ w.T + b
        return y

    # Small batch (single grid tile).
    key, kx = jax.random.split(key)
    x = jax.random.normal(kx, (8, layer_sizes[0]), jnp.float32)
    out = jax.block_until_ready(model(x))
    assert out.shape == (8, layer_sizes[-1])
    assert jnp.allclose(out, ref_forward(x), atol=1e-4, rtol=1e-4)

    # Larger, non-tile-aligned batch (exercises multi-tile grid + padding path).
    key, kx2 = jax.random.split(key)
    x2 = jax.random.normal(kx2, (600, layer_sizes[0]), jnp.float32)
    out2 = jax.block_until_ready(model(x2))
    assert out2.shape == (600, layer_sizes[-1])
    assert jnp.allclose(out2, ref_forward(x2), atol=1e-4, rtol=1e-4)

    print("KERNEL_OK")
</pallas_src>

<mosaic_0001>
module attributes {stable_mosaic.version = 11 : i64} {
  func.func @_fnn_kernel(%arg0: i32, %arg1: memref<8x128xf32, #tpu.memory_space<vmem>>, %arg2: memref<128x128xf32, #tpu.memory_space<vmem>>, %arg3: memref<1x128xf32, #tpu.memory_space<vmem>>, %arg4: memref<128x128xf32, #tpu.memory_space<vmem>>, %arg5: memref<1x128xf32, #tpu.memory_space<vmem>>, %arg6: memref<128x128xf32, #tpu.memory_space<vmem>>, %arg7: memref<1x128xf32, #tpu.memory_space<vmem>>, %arg8: memref<8x128xf32, #tpu.memory_space<vmem>>) attributes {dimension_semantics = [#tpu.dimension_semantics<parallel>], iteration_bounds = array<i64: 1>, scalar_prefetch = 0 : i64, scratch_operands = 0 : i64, tpu.core_type = #tpu.core_type<tc>, window_params = [{transform_indices = @transform_0, window_bounds = array<i64: 8, 128>}, {pipeline_mode = #tpu.pipeline_mode<synchronous>, transform_indices = @transform_1, window_bounds = array<i64: 128, 128>}, {pipeline_mode = #tpu.pipeline_mode<synchronous>, transform_indices = @transform_2, window_bounds = array<i64: 1, 128>}, {pipeline_mode = #tpu.pipeline_mode<synchronous>, transform_indices = @transform_3, window_bounds = array<i64: 128, 128>}, {pipeline_mode = #tpu.pipeline_mode<synchronous>, transform_indices = @transform_4, window_bounds = array<i64: 1, 128>}, {pipeline_mode = #tpu.pipeline_mode<synchronous>, transform_indices = @transform_5, window_bounds = array<i64: 128, 128>}, {pipeline_mode = #tpu.pipeline_mode<synchronous>, transform_indices = @transform_6, window_bounds = array<i64: 1, 128>}, {transform_indices = @transform_7, window_bounds = array<i64: 8, 128>}]} {
    %c0 = arith.constant 0 : index
    %c0_0 = arith.constant 0 : index
    %0 = vector.load %arg1[%c0, %c0_0] : memref<8x128xf32, #tpu.memory_space<vmem>>, vector<8x128xf32>
    %c0_1 = arith.constant 0 : index
    %c0_2 = arith.constant 0 : index
    %1 = vector.load %arg2[%c0_1, %c0_2] : memref<128x128xf32, #tpu.memory_space<vmem>>, vector<128x128xf32>
    %c0_3 = arith.constant 0 : index
    %c0_4 = arith.constant 0 : index
    %2 = vector.load %arg3[%c0_3, %c0_4] : memref<1x128xf32, #tpu.memory_space<vmem>>, vector<1x128xf32>
    %cst = arith.constant dense<0.000000e+00> : vector<8x128xf32>
    %3 = tpu.matmul %0, %1, %cst {dimension_numbers = #tpu.dot_dimension_numbers<[1], [0], [0], [1], [0, 0, 1, 1], [], []>} : vector<8x128xf32>, vector<128x128xf32>, vector<8x128xf32> -> vector<8x128xf32>
    %4 = vector.broadcast %2 : vector<1x128xf32> to vector<8x128xf32>
    %5 = arith.addf %3, %4 : vector<8x128xf32>
    %c0_5 = arith.constant 0 : index
    %c0_6 = arith.constant 0 : index
    %6 = vector.load %arg4[%c0_5, %c0_6] : memref<128x128xf32, #tpu.memory_space<vmem>>, vector<128x128xf32>
    %c0_7 = arith.constant 0 : index
    %c0_8 = arith.constant 0 : index
    %7 = vector.load %arg5[%c0_7, %c0_8] : memref<1x128xf32, #tpu.memory_space<vmem>>, vector<1x128xf32>
    %cst_9 = arith.constant dense<0.000000e+00> : vector<8x128xf32>
    %8 = tpu.matmul %5, %6, %cst_9 {dimension_numbers = #tpu.dot_dimension_numbers<[1], [0], [0], [1], [0, 0, 1, 1], [], []>} : vector<8x128xf32>, vector<128x128xf32>, vector<8x128xf32> -> vector<8x128xf32>
    %9 = vector.broadcast %7 : vector<1x128xf32> to vector<8x128xf32>
    %10 = arith.addf %8, %9 : vector<8x128xf32>
    %c0_10 = arith.constant 0 : index
    %c0_11 = arith.constant 0 : index
    %11 = vector.load %arg6[%c0_10, %c0_11] : memref<128x128xf32, #tpu.memory_space<vmem>>, vector<128x128xf32>
    %c0_12 = arith.constant 0 : index
    %c0_13 = arith.constant 0 : index
    %12 = vector.load %arg7[%c0_12, %c0_13] : memref<1x128xf32, #tpu.memory_space<vmem>>, vector<1x128xf32>
    %cst_14 = arith.constant dense<0.000000e+00> : vector<8x128xf32>
    %13 = tpu.matmul %10, %11, %cst_14 {dimension_numbers = #tpu.dot_dimension_numbers<[1], [0], [0], [1], [0, 0, 1, 1], [], []>} : vector<8x128xf32>, vector<128x128xf32>, vector<8x128xf32> -> vector<8x128xf32>
    %14 = vector.broadcast %12 : vector<1x128xf32> to vector<8x128xf32>
    %15 = arith.addf %13, %14 : vector<8x128xf32>
    %c0_15 = arith.constant 0 : index
    %c0_16 = arith.constant 0 : index
    %16 = vector.load %arg8[%c0_15, %c0_16] : memref<8x128xf32, #tpu.memory_space<vmem>>, vector<8x128xf32>
    tpu.vector_store %arg8[%c0_15, %c0_16], %15 {strides = array<i32>} : memref<8x128xf32, #tpu.memory_space<vmem>>, vector<8x128xf32>,
    return
  }
  func.func @transform_0(%arg0: i32) -> (i32, i32) {
    %c0_i32 = arith.constant 0 : i32
    %c0_i32_0 = arith.constant 0 : i32
    return %arg0, %c0_i32 : i32, i32
  }
  func.func @transform_1(%arg0: i32) -> (i32, i32) {
    %c0_i32 = arith.constant 0 : i32
    %c0_i32_0 = arith.constant 0 : i32
    %c0_i32_1 = arith.constant 0 : i32
    return %c0_i32, %c0_i32_0 : i32, i32
  }
  func.func @transform_2(%arg0: i32) -> (i32, i32) {
    %c0_i32 = arith.constant 0 : i32
    %c0_i32_0 = arith.constant 0 : i32
    %c0_i32_1 = arith.constant 0 : i32
    return %c0_i32, %c0_i32_0 : i32, i32
  }
  func.func @transform_3(%arg0: i32) -> (i32, i32) {
    %c0_i32 = arith.constant 0 : i32
    %c0_i32_0 = arith.constant 0 : i32
    %c0_i32_1 = arith.constant 0 : i32
    return %c0_i32, %c0_i32_0 : i32, i32
  }
  func.func @transform_4(%arg0: i32) -> (i32, i32) {
    %c0_i32 = arith.constant 0 : i32
    %c0_i32_0 = arith.constant 0 : i32
    %c0_i32_1 = arith.constant 0 : i32
    return %c0_i32, %c0_i32_0 : i32, i32
  }
  func.func @transform_5(%arg0: i32) -> (i32, i32) {
    %c0_i32 = arith.constant 0 : i32
    %c0_i32_0 = arith.constant 0 : i32
    %c0_i32_1 = arith.constant 0 : i32
    return %c0_i32, %c0_i32_0 : i32, i32
  }
  func.func @transform_6(%arg0: i32) -> (i32, i32) {
    %c0_i32 = arith.constant 0 : i32
    %c0_i32_0 = arith.constant 0 : i32
    %c0_i32_1 = arith.constant 0 : i32
    return %c0_i32, %c0_i32_0 : i32, i32
  }
  func.func @transform_7(%arg0: i32) -> (i32, i32) {
    %c0_i32 = arith.constant 0 : i32
    %c0_i32_0 = arith.constant 0 : i32
    return %arg0, %c0_i32 : i32, i32
  }
}

</mosaic_0001>

<bundles_post_ra>
// kernel: _fnn_forward.1
= control target key start
LH: loop header
LB: loop body
LE: loop exit
PB: predicated region body
PF: predicated region fallthrough
CT: control target
= control target key end

     0   :  { %12 = vsyncpa [#allocation3], 0  ;;  %s395_s0 = inlined_call_operand.vmem [shape: f32[8,128], index: 0, kind: input, shape index: {}]   ;;  %s396_s1 = inlined_call_operand.hbm [shape: f32[128,128], index: 1, kind: input, shape index: {}]   ;;  %s397_s2 = inlined_call_operand.vmem [shape: f32[1,128], index: 2, kind: input, shape index: {}]   ;;  %s398_s3 = inlined_call_operand.hbm [shape: f32[128,128], index: 3, kind: input, shape index: {}]   ;;  %s399_s4 = inlined_call_operand.vmem [shape: f32[1,128], index: 4, kind: input, shape index: {}]   ;;  %s400_s5 = inlined_call_operand.hbm [shape: f32[128,128], index: 5, kind: input, shape index: {}]   ;;  %s401_s6 = inlined_call_operand.vmem [shape: f32[1,128], index: 6, kind: input, shape index: {}]   ;;  %s402_s7 = inlined_call_operand.hbm [shape: f32[8,128], index: 7, kind: output, shape index: {}]  }
   0x1   :  { %13 = vsyncpa [#allocation6], 0 }
   0x2   :  { %14 = vsyncpa [#allocation4], 0  ;;  %s36_s26 = sshll.u32 %s398_s3, 4  ;;  %s325_s27 = smov [#allocation5]   ;;  %s37_s26 = int_to_ptr.hbm [resolvable:$true] %s36_s26 }
   0x3   :  { %s38_s28 = sshll.u32 %s325_s27, 4  ;;  %s21_s8 = sshll.u32 %s396_s1, 4  ;;  %s39_s28 = int_to_ptr.vmem [resolvable:$true] %s38_s28  ;;  %s22_s8 = int_to_ptr.hbm [resolvable:$true] %s21_s8 }
   0x4   :  { %s326_s9 = smov 128   ;;  %s327_s10 = smov 8  }
   0x5   :  { %44 = dma.hbm_to_vmem [thread:$0]  %s37_s26, 2048, %s39_s28, [#allocation6], %s326_s9, %s326_s9, %s327_s10  }
   0x6   :  { %s328_s11 = smov [#allocation2]   ;;  %s51_s15 = sshll.u32 %s400_s5, 4  ;;  %s52_s15 = int_to_ptr.hbm [resolvable:$true] %s51_s15 }
   0x7   :  { %s23_s12 = sshll.u32 %s328_s11, 4  ;;  %s329_s3 = smov [#allocation7]   ;;  %s24_s12 = int_to_ptr.vmem [resolvable:$true] %s23_s12 }
   0x8   :  { %29 = dma.hbm_to_vmem [thread:$0]  %s22_s8, 2048, %s24_s12, [#allocation3], %s326_s9, %s326_s9, %s327_s10  }
   0x9   :  { %s53_s16 = sshll.u32 %s329_s3, 4  ;;  %s54_s16 = int_to_ptr.vmem [resolvable:$true] %s53_s16 }
   0xa   :  { %59 = dma.hbm_to_vmem [thread:$0]  %s52_s15, 2048, %s54_s16, [#allocation6], %s326_s9, %s326_s9, %s327_s10  }
   0xb   :  { %319 = dma.done.wait [#allocation3], 2048  }
   0xc   :  { %320 = vsyncadd [#allocation3], 4294965248 }
   0xd   :  { %321 = dma.done.wait [#allocation6], 4096  }
   0xe   :  { %322 = vsyncadd [#allocation6], 4294963200  ;;  %v90_v0 = vld [vmem:[#allocation2 + $0x78] sm:$0xff]  ;;  %v89_v1 = vld [vmem:[#allocation2 + $0x70] sm:$0xff]  ;;  %s203_s25 = sshll.u32 %s402_s7, 4  ;;  %s204_s25 = int_to_ptr.hbm [resolvable:$true] %s203_s25 }
   0xf   :  { %95 = vmatpush.msra.mxu0 %v90_v0  ;;  %v88_v2 = vld [vmem:[#allocation2 + $0x68] sm:$0xff]  ;;  %v87_v3 = vld [vmem:[#allocation2 + $0x60] sm:$0xff]  ;;  %v130_v4 = vld [vmem:[#allocation5 + $0x78] sm:$0xff] }
  0x10   :  { %v86_v5 = vld [vmem:[#allocation2 + $0x58] sm:$0xff]  ;;  %135 = vmatpush.msra.mxu1 %v130_v4  ;;  %v129_v6 = vld [vmem:[#allocation5 + $0x70] sm:$0xff]  ;;  %v128_v7 = vld [vmem:[#allocation5 + $0x68] sm:$0xff] }
  0x11   :  { %96 = vmatpush.msra.mxu0 %v89_v1  ;;  %v85_v8 = vld [vmem:[#allocation2 + $0x50] sm:$0xff]  ;;  %v127_v9 = vld [vmem:[#allocation5 + $0x60] sm:$0xff]  ;;  %v84_v10 = vld [vmem:[#allocation2 + $0x48] sm:$0xff] }
  0x12   :  { %136 = vmatpush.msra.mxu1 %v129_v6  ;;  %v126_v11 = vld [vmem:[#allocation5 + $0x58] sm:$0xff]  ;;  %v83_v12 = vld [vmem:[#allocation2 + $0x40] sm:$0xff]  ;;  %v125_v13 = vld [vmem:[#allocation5 + $0x50] sm:$0xff] }
  0x13   :  { %97 = vmatpush.msra.mxu0 %v88_v2  ;;  %v82_v14 = vld [vmem:[#allocation2 + $0x38] sm:$0xff]  ;;  %v124_v15 = vld [vmem:[#allocation5 + $0x48] sm:$0xff]  ;;  %v81_v16 = vld [vmem:[#allocation2 + $0x30] sm:$0xff] }
  0x14   :  { %137 = vmatpush.msra.mxu1 %v128_v7  ;;  %v123_v17 = vld [vmem:[#allocation5 + $0x40] sm:$0xff]  ;;  %v80_v18 = vld [vmem:[#allocation2 + $0x28] sm:$0xff]  ;;  %v122_v19 = vld [vmem:[#allocation5 + $0x38] sm:$0xff] }
  0x15   :  { %98 = vmatpush.msra.mxu0 %v87_v3  ;;  %v79_v20 = vld [vmem:[#allocation2 + $0x20] sm:$0xff]  ;;  %v121_v21 = vld [vmem:[#allocation5 + $0x30] sm:$0xff]  ;;  %v78_v22 = vld [vmem:[#allocation2 + $0x18] sm:$0xff] }
  0x16   :  { %138 = vmatpush.msra.mxu1 %v127_v9  ;;  %v120_v23 = vld [vmem:[#allocation5 + $0x28] sm:$0xff]  ;;  %v77_v24 = vld [vmem:[#allocation2 + $0x10] sm:$0xff]  ;;  %v119_v25 = vld [vmem:[#allocation5 + $0x20] sm:$0xff] }
  0x17   :  { %99 = vmatpush.msra.mxu0 %v86_v5  ;;  %v76_v26 = vld [vmem:[#allocation2 + $0x8] sm:$0xff]  ;;  %v118_v27 = vld [vmem:[#allocation5 + $0x18] sm:$0xff]  ;;  %v75_v28 = vld [vmem:[#allocation2] sm:$0xff] }
  0x18   :  { %139 = vmatpush.msra.mxu1 %v126_v11  ;;  %v74_v29 = vld [vmem:[%s395_s0] sm:$0xff]  ;;  %v117_v30 = vld [vmem:[#allocation5 + $0x10] sm:$0xff]  ;;  %v116_v31 = vld [vmem:[#allocation5 + $0x8] sm:$0xff] }
  0x19   :  { %100 = vmatpush.msra.mxu0 %v85_v8  ;;  %v115_v32 = vld [vmem:[#allocation5] sm:$0xff]  ;;  %v170_v33 = vld [vmem:[#allocation7 + $0x78] sm:$0xff]  ;;  %v169_v34 = vld [vmem:[#allocation7 + $0x70] sm:$0xff] }
  0x1a   :  { %140 = vmatpush.msra.mxu1 %v125_v13  ;;  %175 = vmatpush.msra.mxu2 %v170_v33  ;;  %v168_v35 = vld [vmem:[#allocation7 + $0x68] sm:$0xff]  ;;  %v167_v36 = vld [vmem:[#allocation7 + $0x60] sm:$0xff]  ;;  %v166_v37 = vld [vmem:[#allocation7 + $0x58] sm:$0xff] }
  0x1b   :  { %101 = vmatpush.msra.mxu0 %v84_v10  ;;  %v165_v38 = vld [vmem:[#allocation7 + $0x50] sm:$0xff]  ;;  %v164_v39 = vld [vmem:[#allocation7 + $0x48] sm:$0xff]  ;;  %v163_v40 = vld [vmem:[#allocation7 + $0x40] sm:$0xff] }
  0x1c   :  { %141 = vmatpush.msra.mxu1 %v124_v15  ;;  %176 = vmatpush.msra.mxu2 %v169_v34  ;;  %v162_v41 = vld [vmem:[#allocation7 + $0x38] sm:$0xff]  ;;  %v161_v42 = vld [vmem:[#allocation7 + $0x30] sm:$0xff]  ;;  %v160_v43 = vld [vmem:[#allocation7 + $0x28] sm:$0xff] }
  0x1d   :  { %102 = vmatpush.msra.mxu0 %v83_v12  ;;  %v159_v44 = vld [vmem:[#allocation7 + $0x20] sm:$0xff]  ;;  %v158_v45 = vld [vmem:[#allocation7 + $0x18] sm:$0xff]  ;;  %v157_v46 = vld [vmem:[#allocation7 + $0x10] sm:$0xff] }
  0x1e   :  { %142 = vmatpush.msra.mxu1 %v123_v17  ;;  %177 = vmatpush.msra.mxu2 %v168_v35  ;;  %v220_v47 = vld [vmem:[%s397_s2] ss:$0 sm:$0xff]  ;;  %v156_v50 = vld [vmem:[#allocation7 + $0x8] sm:$0xff]  ;;  %s330_s2 = smov [#allocation8]  }
  0x1f   :  { %103 = vmatpush.msra.mxu0 %v82_v14  ;;  %v155_v51 = vld [vmem:[#allocation7] sm:$0xff]  ;;  %s201_s22 = sshll.u32 %s330_s2, 4  ;;  %s202_s22 = int_to_ptr.vmem [resolvable:$true] %s201_s22 }
  0x20   :  { %143 = vmatpush.msra.mxu1 %v122_v19  ;;  %178 = vmatpush.msra.mxu2 %v167_v36  ;;  %v221_v52 = vld [vmem:[%s399_s4] ss:$0 sm:$0xff] }
  0x21   :  { %104 = vmatpush.msra.mxu0 %v81_v16  ;;  %v222_v55 = vld [vmem:[%s401_s6] ss:$0 sm:$0xff] }
  0x22   :  { %144 = vmatpush.msra.mxu1 %v121_v21  ;;  %179 = vmatpush.msra.mxu2 %v166_v37 }
  0x23   :  { %105 = vmatpush.msra.mxu0 %v80_v18 }
  0x24   :  { %145 = vmatpush.msra.mxu1 %v120_v23  ;;  %180 = vmatpush.msra.mxu2 %v165_v38 }
  0x25   :  { %106 = vmatpush.msra.mxu0 %v79_v20 }
  0x26   :  { %146 = vmatpush.msra.mxu1 %v119_v25  ;;  %181 = vmatpush.msra.mxu2 %v164_v39 }
  0x27   :  { %107 = vmatpush.msra.mxu0 %v78_v22 }
  0x28   :  { %147 = vmatpush.msra.mxu1 %v118_v27  ;;  %182 = vmatpush.msra.mxu2 %v163_v40 }
  0x29   :  { %108 = vmatpush.msra.mxu0 %v77_v24 }
  0x2a   :  { %148 = vmatpush.msra.mxu1 %v117_v30  ;;  %183 = vmatpush.msra.mxu2 %v162_v41 }
  0x2b   :  { %109 = vmatpush.msra.mxu0 %v76_v26 }
  0x2c   :  { %149 = vmatpush.msra.mxu1 %v116_v31  ;;  %184 = vmatpush.msra.mxu2 %v161_v42 }
  0x2d   :  { %110 = vmatpush.msra.mxu0 %v75_v28 }
  0x2e   :  { %111 = vmatmul.f32.vlgmr.msra.gmra.mxu0 %v74_v29  ;;  %150 = vmatpush.msra.mxu1 %v115_v32 }
  0x2f   :  { %185 = vmatpush.msra.mxu2 %v160_v43 }
  0x31   :  { %186 = vmatpush.msra.mxu2 %v159_v44 }
  0x33   :  { %187 = vmatpush.msra.mxu2 %v158_v45 }
  0x35   :  { %188 = vmatpush.msra.mxu2 %v157_v46 }
  0x37   :  { %189 = vmatpush.msra.mxu2 %v156_v50 }
  0x39   :  { %190 = vmatpush.msra.mxu2 %v155_v51 }
  0xab   :  { %v112_v48 = vpop.f32.mrf.mxu0 }
  0xac   :  { %v113_v49 = vadd.f32 %v220_v47, %v112_v48 }
  0xae   :  { %151 = vmatmul.f32.vlgmr.msra.gmra.mxu1 %v113_v49 }
 0x12b   :  { %v152_v53 = vpop.f32.mrf.mxu1 }
 0x12c   :  { %v153_v54 = vadd.f32 %v221_v52, %v152_v53 }
 0x12e   :  { %191 = vmatmul.f32.vlgmr.msra.gmra.mxu2 %v153_v54 }
 0x1b1   :  { %v192_v56 = vpop.f32.mrf.mxu2 }
 0x1b2   :  { %v193_v57 = vadd.f32 %v222_v55, %v192_v56 }
 0x1b4   :  { %195 = vst [vmem:[#allocation8] sm:$0xff] %v193_v57 }
 0x1b5   :  { %206 = dma.vmem_to_hbm [thread:$0]  %s202_s22, 128, %s204_s25, [#allocation4]  }
 0x1b6   :  { %323 = dma.done.wait [#allocation4], 128  }
 0x1b7   :  { %324 = vsyncadd [#allocation4], 4294967168 }
 0x1b8   :  { %211 = vsyncpa [#allocation3], 1 }
 0x1b9   :  { %212 = vsyncpa [#allocation6], 1 }
 0x1ba   :  { %213 = vsyncpa [#allocation4], 1 }

</bundles_post_ra>
